<compile_context>
chip_gen: v7x
topology: tpu7x:2x2x1
jax: 0.10.0
libtpu: 0.0.40
codegen_flags: <defaults>
</compile_context>

<pallas_src>
import functools

import jax
import jax.numpy as jnp
import numpy as np
from jax import lax
from jax.experimental import pallas as pl
from jax.experimental.pallas import tpu as pltpu


_OUT_W = 128                      # lane-dense output width (avoids masked vst)


def _cdiv(a, b):
    return -(-a // b)


def _round_up(a, m):
    return _cdiv(a, m) * m


def _tpu_vmem_capacity_bytes():
    """Generation-aware VMEM capacity (v5e/v6e: 128 MiB, v7x: 64 MiB per TensorCore)."""
    try:
        cap = int(getattr(pltpu.get_tpu_info(), "vmem_capacity_bytes", 0))
        if cap > 0:
            return cap
    except Exception:
        pass
    return 64 << 20               # conservative fallback (v7x per-TC physical VMEM)


_VMEM_CAP = _tpu_vmem_capacity_bytes()
# Explicit scoped-VMEM limit for both kernels; the block budgets below stay well under it.
_VMEM_LIMIT = int(min(max(32 << 20, _VMEM_CAP // 2), 100 << 20))


# ----------------------------------------------------------------------------- kernels


def _beam_topk_kernel(beam_size, lp_ref, sum_ref, ys_ref, ix_ref):
    """Top-`beam_size` of (sum + logprob) over the flattened (beam, vocab) axes.

    lp_ref : (Bb, K, V)    per-beam log-probs (native dtype, cast on-vreg)
    sum_ref: (Bb, K, 1)    running beam log-prob sums
    ys_ref : (Bb, 1, 128)  top-k scores, descending, in lanes [0, beam_size)
    ix_ref : (Bb, 1, 128)  flat indices (beam*V + token)   in lanes [0, beam_size)
    """
    cand = sum_ref[...].astype(jnp.float32) + lp_ref[...].astype(jnp.float32)
    Bb, K, V = cand.shape
    flat = (lax.broadcasted_iota(jnp.int32, (Bb, K, V), 1) * V
            + lax.broadcasted_iota(jnp.int32, (Bb, K, V), 2))
    sentinel = jnp.int32(K * V)
    neg_inf = jnp.float32(-jnp.inf)
    lane = lax.broadcasted_iota(jnp.int32, (Bb, 1, _OUT_W), 2)

    def select_max(work):
        # Fused (value, flat-index) argmax.
        #   stage 1: sequential left-fold over the beam (sublane) axis carrying (val, idx)
        #            pairs; the accumulator always aggregates strictly lower beam indices
        #            than the row being merged, so a strict '>' keeps the lowest flat
        #            index on exact ties (matches lax.top_k).
        #   stage 2: lane reduce on the single surviving (Bb,1,V) row — XLU max plus a
        #            small compare/select/min on 1/K of the data.
        acc_v = work[:, 0:1, :]
        acc_i = flat[:, 0:1, :]
        for r in range(1, K):                          # static: K is small (beam size)
            b_v = work[:, r:r + 1, :]
            take = b_v > acc_v
            acc_v = jnp.where(take, b_v, acc_v)
            acc_i = jnp.where(take, flat[:, r:r + 1, :], acc_i)
        m = jnp.max(acc_v, axis=2, keepdims=True)                              # (Bb,1,1)
        sel = jnp.min(jnp.where(acc_v == m, acc_i, sentinel),
                      axis=2, keepdims=True)                                   # (Bb,1,1)
        return m, sel

    def body(i, carry):
        work, ys_vec, ix_vec = carry
        m, sel = select_max(work)
        ys_vec = jnp.where(lane == i, m, ys_vec)       # lane-dense accumulation, no concat
        ix_vec = jnp.where(lane == i, sel, ix_vec)
        work = jnp.where(flat == sel, neg_inf, work)   # suppress this iteration's winner
        return work, ys_vec, ix_vec

    ys0 = jnp.full((Bb, 1, _OUT_W), neg_inf, jnp.float32)
    ix0 = jnp.zeros((Bb, 1, _OUT_W), jnp.int32)
    # fori_loop (not a Python unroll) bounds live ranges / vreg pressure; the final
    # selection is peeled so its full-array suppression pass is never emitted.
    work, ys_vec, ix_vec = lax.fori_loop(0, beam_size - 1, body, (cand, ys0, ix0))
    m, sel = select_max(work)
    ys_ref[...] = jnp.where(lane == beam_size - 1, m, ys_vec)
    ix_ref[...] = jnp.where(lane == beam_size - 1, sel, ix_vec)


@functools.partial(jax.jit, static_argnums=(2,))
def beam_topk(logprobs3, beam_sum, beam_size):
    """logprobs3: (B, K, V), beam_sum: (B, K) -> (ys (B, beam), flat ix (B, beam)).

    Exactly matches lax.top_k((beam_sum[:, :, None] + logprobs3).reshape(B, -1), beam)."""
    B, K, V = logprobs3.shape
    assert K * V < 2 ** 31, "flat (beam * vocab) index must fit in int32"
    assert 1 <= beam_size <= min(_OUT_W, K * V)
    # live footprint per batch row: 2x double-buffered input + work f32 + flat i32 + fold
    # temporaries (~16 B/elem), sized against the chip's VMEM generation.
    per_batch = K * V * (2 * logprobs3.dtype.itemsize + 24)
    budget = min(_VMEM_CAP // 4, 24 << 20)
    bb = int(max(1, min(_cdiv(B, 2), budget // max(per_batch, 1))))   # cdiv(B,2): 2 v7x TCs
    grid = pl.cdiv(B, bb)
    kernel = functools.partial(_beam_topk_kernel, beam_size)
    ys, ix = pl.pallas_call(
        kernel,
        grid=(grid,),
        in_specs=[
            pl.BlockSpec((bb, K, V), lambda b: (b, 0, 0)),
            pl.BlockSpec((bb, K, 1), lambda b: (b, 0, 0)),
        ],
        out_specs=[
            pl.BlockSpec((bb, 1, _OUT_W), lambda b: (b, 0, 0)),
            pl.BlockSpec((bb, 1, _OUT_W), lambda b: (b, 0, 0)),
        ],
        out_shape=[
            jax.ShapeDtypeStruct((B, 1, _OUT_W), jnp.float32),
            jax.ShapeDtypeStruct((B, 1, _OUT_W), jnp.int32),
        ],
        compiler_params=pltpu.CompilerParams(
            dimension_semantics=("parallel",),
            vmem_limit_bytes=_VMEM_LIMIT),
    )(logprobs3, beam_sum.reshape(B, K, 1))
    return ys[:, 0, :beam_size], ix[:, 0, :beam_size]


def _greedy_kernel(lp_ref, out_ref):
    """Row-wise max / argmax over vocab for one row tile.

    lp_ref : (TN, V); out_ref: (TN, 128) f32, lane 0 = max logprob, lane 1 = argmax."""
    lp = lp_ref[...].astype(jnp.float32)
    V = lp.shape[1]
    m = jnp.max(lp, axis=1, keepdims=True)                                    # (TN, 1)
    col = lax.broadcasted_iota(jnp.int32, lp.shape, 1)
    idx = jnp.min(jnp.where(lp == m, col, jnp.int32(V)), axis=1, keepdims=True)
    idx = jnp.minimum(idx, jnp.int32(V - 1))        # guard: degenerate (all-NaN) row stays in range
    lane = lax.broadcasted_iota(jnp.int32, out_ref.shape, 1)
    # single lane-dense slab (halves output traffic / vst pressure vs two slabs);
    # the argmax is exact as an f32 for any realistic vocab (V < 2^24).
    out_ref[...] = jnp.where(lane == 0, m,
                             jnp.where(lane == 1, idx.astype(jnp.float32), 0.0))


@jax.jit
def greedy_sample(logprobs):
    """logprobs: (N, V) -> (argmax token (N,) int32, max logprob (N,))."""
    N, V = logprobs.shape
    assert V < 2 ** 24, "argmax is carried through the packed f32 output slab"
    # HBM-roofline tile: double-buffered input + in-kernel f32 copy/temps, sized against
    # the chip's VMEM; capped at cdiv(N, 2) rows so the grid can split across 2 v7x TCs.
    per_row = V * (2 * logprobs.dtype.itemsize + 8)
    budget = min(_VMEM_CAP // 4, 32 << 20)
    tile_n = max(8, (budget // max(per_row, 1)) // 8 * 8)
    tile_n = max(8, min(tile_n, _round_up(_cdiv(N, 2), 8)))
    grid = pl.cdiv(N, tile_n)
    packed = pl.pallas_call(
        _greedy_kernel,
        grid=(grid,),
        in_specs=[pl.BlockSpec((tile_n, V), lambda i: (i, 0))],
        out_specs=pl.BlockSpec((tile_n, _OUT_W), lambda i: (i, 0)),
        out_shape=jax.ShapeDtypeStruct((N, _OUT_W), jnp.float32),
        compiler_params=pltpu.CompilerParams(
            dimension_semantics=("parallel",),
            vmem_limit_bytes=_VMEM_LIMIT),
    )(logprobs)
    it = packed[:, 1].astype(jnp.int32)
    vals = packed[:, 0].astype(logprobs.dtype)
    return it, vals


# ----------------------------------------------------------------------------- module


class CaptionModel:
    """JAX mirror of models/CaptionModel.py (parameter-free base class)."""

    def __init__(self, vocab_size, seq_length, beam_size=10):
        self.vocab_size = vocab_size       # logprob dim is vocab_size + 1
        self.seq_length = seq_length
        self.beam_size = beam_size

    # forward dispatch, same as the nn.Module
    def forward(self, *args, **kwargs):
        mode = kwargs.get('mode', 'forward')
        if 'mode' in kwargs:
            del kwargs['mode']
        return getattr(self, '_' + mode)(*args, **kwargs)

    __call__ = forward

    # ---- sample_next_word -------------------------------------------------
    def _sample_next_word(self, logprobs, sample_method):
        return self.sample_next_word(logprobs, sample_method)

    def sample_next_word(self, logprobs, sample_method):
        assert sample_method in {'greedy', 'sample'}
        if sample_method == 'greedy':
            it, sampleLogprobs = greedy_sample(logprobs)      # Pallas hot path
            return it, sampleLogprobs
        # TODO(synk): torch.distributions.Categorical sampling path not implemented in Pallas.
        raise NotImplementedError("only 'greedy' sampling is implemented")

    # ---- beam_search ------------------------------------------------------
    def _beam_search(self, init_state, init_logprobs, get_logprobs_state, opt=None):
        return self.beam_search(init_state, init_logprobs, get_logprobs_state, opt=opt)

    def beam_search(self, init_state, init_logprobs, get_logprobs_state, opt=None):
        opt = opt or {}
        beam_size = opt.get('beam_size', self.beam_size)
        # TODO(synk): utils.penalty_builder not available; '' penalty is the identity.
        length_penalty = lambda length, logp: logp

        batch_size = init_logprobs.shape[0]
        state = [s for s in init_state]
        logprobs = init_logprobs
        beam_logprobs_sum = jnp.zeros((batch_size, 1), jnp.float32)

        # Per-step records (device side, async D2H): tokens / parent backpointers / sums
        # are tiny; chosen_lp is one (B, beam, V) slab per step, transferred ONCE at the
        # end.  No growing-array concat / gather -> O(T) device work + O(T) D2H, vs the
        # torch reference's O(T^2) gather+concat bookkeeping (semantics identical).
        toks, parents, sums, step_lps = [], [], [], []
        for t in range(self.seq_length):
            V = logprobs.shape[-1]
            lp3 = logprobs.reshape(batch_size, -1, V)
            K = lp3.shape[1]                      # 1 at t == 0 (K=1 kernel specialization)

            ys, ix = beam_topk(lp3, beam_logprobs_sum, beam_size)        # Pallas hot path
            beam_ix = ix // V                     # parent beam backpointers   (B, beam)
            sel_ix = ix % V                       # chosen tokens               (B, beam)
            chosen_lp = jnp.take_along_axis(lp3, beam_ix[:, :, None], axis=1)  # (B, beam, V)

            for a in (sel_ix, beam_ix, ys, chosen_lp):   # overlap D2H with decoding
                if hasattr(a, 'copy_to_host_async'):
                    a.copy_to_host_async()
            toks.append(sel_ix)
            parents.append(beam_ix)
            sums.append(ys)
            step_lps.append(chosen_lp)

            # suppress finished beams for the next step (torch: beam_logprobs_sum[k, end] -= 1000)
            end_mask = (sel_ix == 0)
            beam_logprobs_sum = ys - 1000.0 * end_mask.astype(jnp.float32)

            state_ix = (beam_ix + jnp.arange(batch_size, dtype=beam_ix.dtype)[:, None]
                        * K).reshape(-1)
            state = [s[:, state_ix] for s in state]
            it = sel_ix.reshape(-1)
            logprobs, state = get_logprobs_state(it, state)

        # single host transfer after the decode loop (no per-timestep sync)
        toks, parents, sums, step_lps = jax.device_get((toks, parents, sums, step_lps))

        # host bookkeeping: reconstruct each finished beam from the backpointers — this is
        # exactly the per-step gathered+concatenated beam_seq / beam_seq_logprobs of torch.
        done_beams = [[] for _ in range(batch_size)]
        for t in range(self.seq_length):
            for k in range(batch_size):
                is_end = np.asarray(toks[t][k] == 0)
                if t == self.seq_length - 1:
                    is_end = np.ones_like(is_end, dtype=bool)
                for vix in range(beam_size):
                    if is_end[vix]:
                        seq = np.zeros(t + 1, dtype=np.int32)
                        logps = np.zeros((t + 1, step_lps[t].shape[-1]), dtype=np.float32)
                        slot = vix
                        for s in range(t, -1, -1):
                            seq[s] = toks[s][k, slot]
                            logps[s] = step_lps[s][k, slot]
                            slot = int(parents[s][k, slot])
                        done_beams[k].append({
                            'seq': seq,
                            'logps': logps,
                            'p': length_penalty(t + 1, float(sums[t][k, vix])),
                        })
        done_beams = [sorted(done_beams[k], key=lambda x: -x['p'])[:beam_size]
                      for k in range(batch_size)]
        return done_beams

    def decode_sequence(self, seq):
        # TODO(synk): utils.decode_sequence / self.vocab are not available in this script.
        raise NotImplementedError


# ----------------------------------------------------------------- demo reference (numpy)


def _ref_beam_search(init_state, init_logprobs, get_logprobs_state, seq_length, beam_size):
    """Numpy transliteration of the torch CaptionModel.beam_search (regression reference)."""
    batch_size = init_logprobs.shape[0]
    Vp1 = init_logprobs.shape[-1]
    beam_seq = np.zeros((batch_size, beam_size, 0), np.int64)
    beam_seq_logprobs = np.zeros((batch_size, beam_size, 0, Vp1), np.float32)
    beam_logprobs_sum = np.zeros((batch_size, 1), np.float32)
    done_beams = [[] for _ in range(batch_size)]
    state = [np.asarray(s) for s in init_state]
    logprobs = np.asarray(init_logprobs)
    for t in range(seq_length):
        V = logprobs.shape[-1]
        lp3 = logprobs.reshape(batch_size, -1, V)
        K = lp3.shape[1]
        cand = beam_logprobs_sum[:, :, None] + lp3
        flatc = cand.reshape(batch_size, -1)
        ix = np.argsort(-flatc, axis=-1, kind='stable')[:, :beam_size]
        beam_ix = ix // V
        sel_ix = ix % V
        state_ix = (beam_ix + np.arange(batch_size)[:, None] * K).reshape(-1)
        if t > 0:
            beam_seq = np.take_along_axis(beam_seq, beam_ix[:, :, None], axis=1)
            beam_seq_logprobs = np.take_along_axis(
                beam_seq_logprobs, beam_ix[:, :, None, None], axis=1)
        beam_seq = np.concatenate([beam_seq, sel_ix[:, :, None]], axis=-1)
        beam_logprobs_sum = (np.take_along_axis(beam_logprobs_sum, beam_ix, axis=1)
                             + np.take_along_axis(lp3.reshape(batch_size, -1), ix, axis=1))
        beam_lp = np.take_along_axis(lp3, beam_ix[:, :, None], axis=1)
        beam_seq_logprobs = np.concatenate(
            [beam_seq_logprobs, beam_lp[:, :, None, :]], axis=2)
        state = [np.asarray(s)[:, state_ix] for s in state]
        for k in range(batch_size):
            is_end = beam_seq[k, :, t] == 0
            if t == seq_length - 1:
                is_end[:] = True
            for vix in range(beam_size):
                if is_end[vix]:
                    done_beams[k].append({'seq': beam_seq[k, vix].copy(),
                                          'logps': beam_seq_logprobs[k, vix].copy(),
                                          'p': float(beam_logprobs_sum[k, vix])})
            beam_logprobs_sum[k, is_end] -= 1000
        it = jnp.asarray(beam_seq[:, :, t].reshape(-1))
        logprobs, state_j = get_logprobs_state(it, [jnp.asarray(s) for s in state])
        logprobs = np.asarray(logprobs)
        state = [np.asarray(s) for s in state_j]
    return [sorted(done_beams[k], key=lambda x: -x['p'])[:beam_size]
            for k in range(batch_size)]


# ----------------------------------------------------------------------------- demo


if __name__ == "__main__":
    B, BEAM, H = 2, 4, 32
    VOCAB_P1 = 128                       # vocab_size + 1
    SEQ_LEN = 3

    key = jax.random.PRNGKey(0)
    k1, k2, k3, kE, kU, kW, kH = jax.random.split(key, 7)

    model = CaptionModel(vocab_size=VOCAB_P1 - 1, seq_length=SEQ_LEN, beam_size=BEAM)

    # ---- beam_topk kernel vs lax.top_k (regression test, K = beam and K = 1) ----
    lp3 = jax.nn.log_softmax(jax.random.normal(k1, (B, BEAM, VOCAB_P1), jnp.float32), axis=-1)
    sums = jax.random.normal(k2, (B, BEAM), jnp.float32)
    ys, ix = beam_topk(lp3, sums, BEAM)
    jax.block_until_ready((ys, ix))
    ref_ys, ref_ix = lax.top_k((sums[:, :, None] + lp3).reshape(B, -1), BEAM)
    np.testing.assert_allclose(np.asarray(ys), np.asarray(ref_ys), rtol=1e-6, atol=1e-6)
    assert np.array_equal(np.asarray(ix), np.asarray(ref_ix)), "top-k index mismatch"

    lp1 = lp3[:, :1, :]                                   # K = 1 (t == 0) specialization
    ys1, ix1 = beam_topk(lp1, jnp.zeros((B, 1), jnp.float32), BEAM)
    jax.block_until_ready((ys1, ix1))
    ref_ys1, ref_ix1 = lax.top_k(lp1.reshape(B, -1), BEAM)
    np.testing.assert_allclose(np.asarray(ys1), np.asarray(ref_ys1), rtol=1e-6, atol=1e-6)
    assert np.array_equal(np.asarray(ix1), np.asarray(ref_ix1)), "K=1 top-k index mismatch"

    # ---- greedy sample_next_word via the forward dispatch -----------------
    lp2d = jax.nn.log_softmax(jax.random.normal(k3, (B * BEAM, VOCAB_P1), jnp.float32), axis=-1)
    it, sample_lp = model(lp2d, 'greedy', mode='sample_next_word')
    jax.block_until_ready((it, sample_lp))
    assert np.array_equal(np.asarray(it), np.asarray(jnp.argmax(lp2d, axis=1)))
    np.testing.assert_allclose(np.asarray(sample_lp), np.asarray(jnp.max(lp2d, axis=1)),
                               rtol=1e-6, atol=1e-6)

    # ---- full beam_search vs the numpy transliteration of the torch reference ----
    # (get_logprobs_state belongs to the *subclass* model, so it is plain JAX glue.)
    E = 0.1 * jax.random.normal(kE, (VOCAB_P1, H), jnp.float32)
    U = 0.1 * jax.random.normal(kU, (H, H), jnp.float32)
    Wo = 0.1 * jax.random.normal(kW, (H, VOCAB_P1), jnp.float32)

    def get_logprobs_state(it, state):
        h = state[0][0]                                   # (N, H)
        h_new = jnp.tanh(E[it] + h @ U)
        return jax.nn.log_softmax(h_new @ Wo, axis=-1), [h_new[None]]

    init_logprobs = jax.nn.log_softmax(
        jax.random.normal(k3, (B, VOCAB_P1), jnp.float32), axis=-1)
    init_state = [0.1 * jax.random.normal(kH, (1, B, H), jnp.float32)]

    done_beams = model(init_state, init_logprobs, get_logprobs_state,
                       {'beam_size': BEAM}, mode='beam_search')
    ref_beams = _ref_beam_search(init_state, init_logprobs, get_logprobs_state,
                                 SEQ_LEN, BEAM)

    assert len(done_beams) == B
    for k in range(B):
        assert len(done_beams[k]) == BEAM
        assert len(done_beams[k]) == len(ref_beams[k])
        for got, ref in zip(done_beams[k], ref_beams[k]):
            assert got['seq'].shape[0] <= SEQ_LEN
            assert got['logps'].shape[-1] == VOCAB_P1
            assert np.array_equal(np.asarray(got['seq'], np.int64),
                                  np.asarray(ref['seq'], np.int64))
            np.testing.assert_allclose(got['logps'], ref['logps'], rtol=1e-5, atol=1e-5)
            np.testing.assert_allclose(got['p'], ref['p'], rtol=1e-5, atol=1e-5)

    print("KERNEL_OK")
</pallas_src>

<mosaic_0001>
module attributes {stable_mosaic.version = 11 : i64} {
  func.func @_beam_topk_kernel(%arg0: i32, %arg1: memref<1x4x128xf32, #tpu.memory_space<vmem>>, %arg2: memref<1x4x1xf32, #tpu.memory_space<vmem>>, %arg3: memref<1x1x128xf32, #tpu.memory_space<vmem>>, %arg4: memref<1x1x128xi32, #tpu.memory_space<vmem>>) attributes {dimension_semantics = [#tpu.dimension_semantics<parallel>], iteration_bounds = array<i64: 2>, scalar_prefetch = 0 : i64, scratch_operands = 0 : i64, tpu.core_type = #tpu.core_type<tc>, window_params = [{transform_indices = @transform_0, window_bounds = array<i64: 1, 4, 128>}, {transform_indices = @transform_1, window_bounds = array<i64: 1, 4, 1>}, {transform_indices = @transform_2, window_bounds = array<i64: 1, 1, 128>}, {transform_indices = @transform_3, window_bounds = array<i64: 1, 1, 128>}]} {
    %c0 = arith.constant 0 : index
    %c0_0 = arith.constant 0 : index
    %c0_1 = arith.constant 0 : index
    %0 = vector.load %arg2[%c0, %c0_0, %c0_1] : memref<1x4x1xf32, #tpu.memory_space<vmem>>, vector<1x4x1xf32>
    %c0_2 = arith.constant 0 : index
    %c0_3 = arith.constant 0 : index
    %c0_4 = arith.constant 0 : index
    %1 = vector.load %arg1[%c0_2, %c0_3, %c0_4] : memref<1x4x128xf32, #tpu.memory_space<vmem>>, vector<1x4x128xf32>
    %2 = vector.broadcast %0 : vector<1x4x1xf32> to vector<1x4x128xf32>
    %3 = arith.addf %2, %1 : vector<1x4x128xf32>
    %4 = tpu.iota {dimensions = array<i32: 1>} : vector<1x4x128xi32>
    %c128_i32 = arith.constant 128 : i32
    %5 = vector.broadcast %c128_i32 : i32 to vector<1x4x128xi32>
    %6 = arith.muli %4, %5 : vector<1x4x128xi32>
    %7 = tpu.iota {dimensions = array<i32: 2>} : vector<1x4x128xi32>
    %8 = arith.addi %6, %7 : vector<1x4x128xi32>
    %9 = tpu.iota {dimensions = array<i32: 2>} : vector<1x1x128xi32>
    %cst = arith.constant 0xFF800000 : f32
    %10 = vector.broadcast %cst : f32 to vector<1x1x128xf32>
    %c0_i32 = arith.constant 0 : i32
    %11 = vector.broadcast %c0_i32 : i32 to vector<1x1x128xi32>
    %c512_i32 = arith.constant 512 : i32
    %cst_5 = arith.constant 0xFF800000 : f32
    %c0_i32_6 = arith.constant 0 : i32
    %c3_i32 = arith.constant 3 : i32
    %12 = arith.addi %c0_i32_6, %c3_i32 : i32
    %c1_i32 = arith.constant 1 : i32
    %13:3 = scf.for %arg5 = %c0_i32_6 to %12 step %c1_i32 iter_args(%arg6 = %3, %arg7 = %10, %arg8 = %11) -> (vector<1x4x128xf32>, vector<1x1x128xf32>, vector<1x1x128xi32>)  : i32 {
      %51 = vector.extract_strided_slice %arg6 {offsets = [0, 0, 0], sizes = [1, 1, 128], strides = [1, 1, 1]} : vector<1x4x128xf32> to vector<1x1x128xf32>
      %52 = vector.extract_strided_slice %8 {offsets = [0, 0, 0], sizes = [1, 1, 128], strides = [1, 1, 1]} : vector<1x4x128xi32> to vector<1x1x128xi32>
      %53 = vector.extract_strided_slice %arg6 {offsets = [0, 1, 0], sizes = [1, 1, 128], strides = [1, 1, 1]} : vector<1x4x128xf32> to vector<1x1x128xf32>
      %54 = arith.cmpf ogt, %53, %51 : vector<1x1x128xf32>
      %55 = arith.select %54, %53, %51 : vector<1x1x128xi1>, vector<1x1x128xf32>
      %56 = vector.extract_strided_slice %8 {offsets = [0, 1, 0], sizes = [1, 1, 128], strides = [1, 1, 1]} : vector<1x4x128xi32> to vector<1x1x128xi32>
      %57 = arith.select %54, %56, %52 : vector<1x1x128xi1>, vector<1x1x128xi32>
      %58 = vector.extract_strided_slice %arg6 {offsets = [0, 2, 0], sizes = [1, 1, 128], strides = [1, 1, 1]} : vector<1x4x128xf32> to vector<1x1x128xf32>
      %59 = arith.cmpf ogt, %58, %55 : vector<1x1x128xf32>
      %60 = arith.select %59, %58, %55 : vector<1x1x128xi1>, vector<1x1x128xf32>
      %61 = vector.extract_strided_slice %8 {offsets = [0, 2, 0], sizes = [1, 1, 128], strides = [1, 1, 1]} : vector<1x4x128xi32> to vector<1x1x128xi32>
      %62 = arith.select %59, %61, %57 : vector<1x1x128xi1>, vector<1x1x128xi32>
      %63 = vector.extract_strided_slice %arg6 {offsets = [0, 3, 0], sizes = [1, 1, 128], strides = [1, 1, 1]} : vector<1x4x128xf32> to vector<1x1x128xf32>
      %64 = arith.cmpf ogt, %63, %60 : vector<1x1x128xf32>
      %65 = arith.select %64, %63, %60 : vector<1x1x128xi1>, vector<1x1x128xf32>
      %66 = vector.extract_strided_slice %8 {offsets = [0, 3, 0], sizes = [1, 1, 128], strides = [1, 1, 1]} : vector<1x4x128xi32> to vector<1x1x128xi32>
      %67 = arith.select %64, %66, %62 : vector<1x1x128xi1>, vector<1x1x128xi32>
      %cst_19 = arith.constant dense<0xFF800000> : vector<1x1xf32>
      %68 = vector.multi_reduction <maximumf>, %65, %cst_19 [2] : vector<1x1x128xf32> to vector<1x1xf32>
      %69 = vector.shape_cast %68 : vector<1x1xf32> to vector<1x1x1xf32>
      %70 = vector.broadcast %69 : vector<1x1x1xf32> to vector<1x1x128xf32>
      %71 = arith.cmpf oeq, %65, %70 : vector<1x1x128xf32>
      %72 = vector.broadcast %c512_i32 : i32 to vector<1x1x128xi32>
      %73 = arith.select %71, %67, %72 : vector<1x1x128xi1>, vector<1x1x128xi32>
      %cst_20 = arith.constant dense<2147483647> : vector<1x1xi32>
      %74 = vector.multi_reduction <minsi>, %73, %cst_20 [2] : vector<1x1x128xi32> to vector<1x1xi32>
      %75 = vector.shape_cast %74 : vector<1x1xi32> to vector<1x1x1xi32>
      %76 = vector.broadcast %arg5 : i32 to vector<1x1x128xi32>
      %77 = arith.cmpi eq, %9, %76 : vector<1x1x128xi32>
      %78 = vector.shape_cast %69 : vector<1x1x1xf32> to vector<1x1x1xf32>
      %79 = vector.broadcast %78 : vector<1x1x1xf32> to vector<1x1x128xf32>
      %80 = arith.select %77, %79, %arg7 : vector<1x1x128xi1>, vector<1x1x128xf32>
      %81 = vector.broadcast %arg5 : i32 to vector<1x1x128xi32>
      %82 = arith.cmpi eq, %9, %81 : vector<1x1x128xi32>
      %83 = vector.shape_cast %75 : vector<1x1x1xi32> to vector<1x1x1xi32>
      %84 = vector.broadcast %83 : vector<1x1x1xi32> to vector<1x1x128xi32>
      %85 = arith.select %82, %84, %arg8 : vector<1x1x128xi1>, vector<1x1x128xi32>
      %86 = vector.broadcast %75 : vector<1x1x1xi32> to vector<1x4x128xi32>
      %87 = arith.cmpi eq, %8, %86 : vector<1x4x128xi32>
      %88 = vector.broadcast %cst_5 : f32 to vector<1x4x128xf32>
      %89 = arith.select %87, %88, %arg6 : vector<1x4x128xi1>, vector<1x4x128xf32>
      scf.yield %89, %80, %85 : vector<1x4x128xf32>, vector<1x1x128xf32>, vector<1x1x128xi32>
    }
    %c3_i32_7 = arith.constant 3 : i32
    %14 = vector.extract_strided_slice %13#0 {offsets = [0, 0, 0], sizes = [1, 1, 128], strides = [1, 1, 1]} : vector<1x4x128xf32> to vector<1x1x128xf32>
    %15 = vector.extract_strided_slice %8 {offsets = [0, 0, 0], sizes = [1, 1, 128], strides = [1, 1, 1]} : vector<1x4x128xi32> to vector<1x1x128xi32>
    %16 = vector.extract_strided_slice %13#0 {offsets = [0, 1, 0], sizes = [1, 1, 128], strides = [1, 1, 1]} : vector<1x4x128xf32> to vector<1x1x128xf32>
    %17 = arith.cmpf ogt, %16, %14 : vector<1x1x128xf32>
    %18 = arith.select %17, %16, %14 : vector<1x1x128xi1>, vector<1x1x128xf32>
    %19 = vector.extract_strided_slice %8 {offsets = [0, 1, 0], sizes = [1, 1, 128], strides = [1, 1, 1]} : vector<1x4x128xi32> to vector<1x1x128xi32>
    %20 = arith.select %17, %19, %15 : vector<1x1x128xi1>, vector<1x1x128xi32>
    %21 = vector.extract_strided_slice %13#0 {offsets = [0, 2, 0], sizes = [1, 1, 128], strides = [1, 1, 1]} : vector<1x4x128xf32> to vector<1x1x128xf32>
    %22 = arith.cmpf ogt, %21, %18 : vector<1x1x128xf32>
    %23 = arith.select %22, %21, %18 : vector<1x1x128xi1>, vector<1x1x128xf32>
    %24 = vector.extract_strided_slice %8 {offsets = [0, 2, 0], sizes = [1, 1, 128], strides = [1, 1, 1]} : vector<1x4x128xi32> to vector<1x1x128xi32>
    %25 = arith.select %22, %24, %20 : vector<1x1x128xi1>, vector<1x1x128xi32>
    %26 = vector.extract_strided_slice %13#0 {offsets = [0, 3, 0], sizes = [1, 1, 128], strides = [1, 1, 1]} : vector<1x4x128xf32> to vector<1x1x128xf32>
    %27 = arith.cmpf ogt, %26, %23 : vector<1x1x128xf32>
    %28 = arith.select %27, %26, %23 : vector<1x1x128xi1>, vector<1x1x128xf32>
    %29 = vector.extract_strided_slice %8 {offsets = [0, 3, 0], sizes = [1, 1, 128], strides = [1, 1, 1]} : vector<1x4x128xi32> to vector<1x1x128xi32>
    %30 = arith.select %27, %29, %25 : vector<1x1x128xi1>, vector<1x1x128xi32>
    %cst_8 = arith.constant dense<0xFF800000> : vector<1x1xf32>
    %31 = vector.multi_reduction <maximumf>, %28, %cst_8 [2] : vector<1x1x128xf32> to vector<1x1xf32>
    %32 = vector.shape_cast %31 : vector<1x1xf32> to vector<1x1x1xf32>
    %33 = vector.broadcast %32 : vector<1x1x1xf32> to vector<1x1x128xf32>
    %34 = arith.cmpf oeq, %28, %33 : vector<1x1x128xf32>
    %c512_i32_9 = arith.constant 512 : i32
    %35 = vector.broadcast %c512_i32_9 : i32 to vector<1x1x128xi32>
    %36 = arith.select %34, %30, %35 : vector<1x1x128xi1>, vector<1x1x128xi32>
    %cst_10 = arith.constant dense<2147483647> : vector<1x1xi32>
    %37 = vector.multi_reduction <minsi>, %36, %cst_10 [2] : vector<1x1x128xi32> to vector<1x1xi32>
    %38 = vector.shape_cast %37 : vector<1x1xi32> to vector<1x1x1xi32>
    %c3_i32_11 = arith.constant 3 : i32
    %39 = vector.broadcast %c3_i32_11 : i32 to vector<1x1x128xi32>
    %40 = arith.cmpi eq, %9, %39 : vector<1x1x128xi32>
    %41 = vector.shape_cast %32 : vector<1x1x1xf32> to vector<1x1x1xf32>
    %42 = vector.broadcast %41 : vector<1x1x1xf32> to vector<1x1x128xf32>
    %43 = arith.select %40, %42, %13#1 : vector<1x1x128xi1>, vector<1x1x128xf32>
    %c0_12 = arith.constant 0 : index
    %c0_13 = arith.constant 0 : index
    %c0_14 = arith.constant 0 : index
    %44 = vector.load %arg3[%c0_12, %c0_13, %c0_14] : memref<1x1x128xf32, #tpu.memory_space<vmem>>, vector<1x1x128xf32>
    tpu.vector_store %arg3[%c0_12, %c0_13, %c0_14], %43 {strides = array<i32>} : memref<1x1x128xf32, #tpu.memory_space<vmem>>, vector<1x1x128xf32>,
    %c3_i32_15 = arith.constant 3 : i32
    %45 = vector.broadcast %c3_i32_15 : i32 to vector<1x1x128xi32>
    %46 = arith.cmpi eq, %9, %45 : vector<1x1x128xi32>
    %47 = vector.shape_cast %38 : vector<1x1x1xi32> to vector<1x1x1xi32>
    %48 = vector.broadcast %47 : vector<1x1x1xi32> to vector<1x1x128xi32>
    %49 = arith.select %46, %48, %13#2 : vector<1x1x128xi1>, vector<1x1x128xi32>
    %c0_16 = arith.constant 0 : index
    %c0_17 = arith.constant 0 : index
    %c0_18 = arith.constant 0 : index
    %50 = vector.load %arg4[%c0_16, %c0_17, %c0_18] : memref<1x1x128xi32, #tpu.memory_space<vmem>>, vector<1x1x128xi32>
    tpu.vector_store %arg4[%c0_16, %c0_17, %c0_18], %49 {strides = array<i32>} : memref<1x1x128xi32, #tpu.memory_space<vmem>>, vector<1x1x128xi32>,
    return
  }
  func.func @transform_0(%arg0: i32) -> (i32, i32, i32) {
    %c0_i32 = arith.constant 0 : i32
    %c0_i32_0 = arith.constant 0 : i32
    %c0_i32_1 = arith.constant 0 : i32
    return %arg0, %c0_i32, %c0_i32_0 : i32, i32, i32
  }
  func.func @transform_1(%arg0: i32) -> (i32, i32, i32) {
    %c0_i32 = arith.constant 0 : i32
    %c0_i32_0 = arith.constant 0 : i32
    %c0_i32_1 = arith.constant 0 : i32
    return %arg0, %c0_i32, %c0_i32_0 : i32, i32, i32
  }
  func.func @transform_2(%arg0: i32) -> (i32, i32, i32) {
    %c0_i32 = arith.constant 0 : i32
    %c0_i32_0 = arith.constant 0 : i32
    %c0_i32_1 = arith.constant 0 : i32
    return %arg0, %c0_i32, %c0_i32_0 : i32, i32, i32
  }
  func.func @transform_3(%arg0: i32) -> (i32, i32, i32) {
    %c0_i32 = arith.constant 0 : i32
    %c0_i32_0 = arith.constant 0 : i32
    %c0_i32_1 = arith.constant 0 : i32
    return %arg0, %c0_i32, %c0_i32_0 : i32, i32, i32
  }
}

</mosaic_0001>

<bundles_post_ra>
// kernel: beam_topk.1
= control target key start
LH: loop header
LB: loop body
LE: loop exit
PB: predicated region body
PF: predicated region fallthrough
CT: control target
= control target key end

     0   :  { %9 = vsyncpa [#allocation3], 0  ;;  %s883_s0 = inlined_call_operand.vmem [shape: f32[2,4,128], index: 0, kind: input, shape index: {}]   ;;  %s884_s1 = inlined_call_operand.vmem [shape: f32[2,4,1], index: 1, kind: input, shape index: {}]   ;;  %s885_s2 = inlined_call_operand.hbm [shape: f32[2,1,128], index: 2, kind: output, shape index: {0}]   ;;  %s886_s3 = inlined_call_operand.hbm [shape: s32[2,1,128], index: 3, kind: output, shape index: {1}]  }
   0x1   :  { %11 = vsyncpa [#allocation3 + $0x1], 0 }
   0x2   :  { %12 = vsyncpa [#allocation5], 0 }
   0x3   :  { %14 = vsyncpa [#allocation5 + $0x1], 0  ;;  %s692_s12 = smov 0   ;;  %s694_s13 = smov 0  }
   0x4   :  { %s696_s14 = smov 0   ;;  %s698_s15 = smov 0  }
   0x5 LB: > { %s713_s16 = sadd.s32 4294967295, %s651_s15   ;;  %s453_s17 = sadd.s32 4294967294, %s651_s15   ;;  %s651_s15 = sphi %s698_s15, %s895_s15   ;;  %s647_s14 = sphi %s696_s14, %s894_s14   ;;  %s643_s13 = sphi %s694_s13, %s893_s13   ;;  %s639_s12 = sphi %s692_s12, %s892_s12  }
   0x6   : > { %s717_s18 = sadd.s32 1, %s651_s15   ;;  %s79_s19 = sadd.s32 1, %s647_s14 }
   0x7   : > { %s76_s20 = ssub.s32 %s651_s15, %s717_s18  ;;  %p89_p0 = scmp.ne.s32.totalorder %s647_s14, %s643_s13 }
   0x8   : > { %p77_p1 = scmp.eq.s32.totalorder %s76_s20, 0  ;;  %p90_p2 = scmp.eq.s32.totalorder %s713_s16, 1 }
   0x9   : > { %p95_p3 = scmp.ne.s32.totalorder %s643_s13, %s639_s12  ;;  %p96_p4 = scmp.eq.s32.totalorder %s453_s17, 1 }
   0xa   : > { %s728_s21 = scalar_select %p77_p1, %s647_s14, %s79_s19  }
   0xb   : > { %p730_p5 = por %p90_p2, %p89_p0  ;;  %p734_p6 = por %p96_p4, %p95_p3 }
   0xc   : > { %p456_p7 = scmp.ge.s32.totalorder %s651_s15, 1  ;;  %p154_p8 = scmp.lt.s32.totalorder %s651_s15, 3 }
   0xe   : > { %p155_p9 = pnand %p456_p7, %p154_p8 }
   0xf   : > { %p184_p10 = scmp.lt.s32.totalorder (!%p155_p9), %s713_s16, 1  ;;  %v669_v0 = vmov (!%p155_p9), 0   ;;  %v200_v1 = vlaneseq (!%p155_p9)  ;;  %s751_s29 = sand.u32 (!%p155_p9), 1, %s643_s13   ;;  %v653_v10 = vmov (!%p155_p9), 0   ;;  %v657_v11 = vmov (!%p155_p9), -inf  }
  0x10   : > { %158 = sbr.rel (%p155_p9) target bundleno = 1082 (0x43a), region = 28  ;;  %540 = vset.pattern.permute.xlu0 (!%p155_p9), %v669_v0  ;;  %s177_s6 = scalar_lea.vmem (!%p155_p9), [#allocation2], %s751_s29 }
  0x11   : > { %v742_v2 = vshrl.u32 (!%p155_p9), %v200_v1, 7  ;;  %v748_v4 = vand.u32 (!%p155_p9), 127, %v200_v1  ;;  %s183_s7 = scalar_lea.vmem (!%p155_p9), [#allocation4], %s751_s29  ;;  %s761_s8 = smov (!%p155_p9), 0  }
  0x13   : > { %v202_v3 = vmul.u32 (!%p155_p9), 128, %v742_v2 }
  0x15   : > { %v754_v6 = vadd.s32 (!%p155_p9), %v748_v4, %v202_v3 }
  0x17   : > { %s185_s24 = scalar_select %p184_p10, %s713_s16, 1 }
  0x19   : > { %s457_s25 = sshll.u32 %s185_s24, 2 }
  0x1a   : > { %s191_s28 = scalar_lea.vmem %s884_s1, %s457_s25  ;;  %s187_s5 = scalar_lea.vmem %s883_s0, %s457_s25 }
  0x1b   : > { %v192_v5 = vld [vmem:[%s191_s28] sm:$0xf] }
  0x1c   : > { %196 = vperm.xlu0 %540, %v192_v5   ;;  %v193_v7 = vld [vmem:[%s187_s5] sm:$0xf] }
  0x9b   : > { %v197_v8 = vpop.permute.xlu0 %196 }
  0x9c   : > { %v199_v9 = vadd.f32 %v197_v8, %v193_v7  }
  0x9e   : > { %v661_v12 = vmov %v199_v9  }
  0x9f LB: >> { %v220_v13 = vrot.slane %v754_v6, 7  ;;  %v216_v14 = vrot.slane %v663_v12, 7  ;;  %vm236_vm2 = vcmask 1043459   ;;  %v257_v26 = vstv %s667_s8  ;;  %s211_s8 = sadd.s32 1, %s667_s8   ;;  %s667_s8 = sphi %s761_s8, %s211_s8   ;;  %v663_v12 = vphi %v661_v12, %v662_v12   ;;  %v659_v11 = vphi %v657_v11, %v658_v11   ;;  %v655_v10 = vphi %v653_v10, %v654_v10  }
  0xa0   : >> { %vm773_vm4 = vcmp.eq.s32.totalorder %v748_v4, %v257_v26  ;;  %v263_v41 = vsub.s32 3, %v742_v2  ;;  %p208_p11 = scmp.ge.s32.totalorder %s211_s8, 3  }
  0xa1   : >> { %vm218_vm0 = vcmp.gt.f32.partialorder %v663_v12, %v216_v14  ;;  %vm309_vm11 = vcmp.eq.s32.totalorder (%p208_p11), %v748_v4, 3  ;;  %s459_s9 = sshll.u32 (%p208_p11), %s713_s16, 4  ;;  %s331_s19 = sshll.u32 (%p208_p11), %s177_s6, 4  ;;  %s332_s19 = int_to_ptr.vmem [resolvable:$true] %s331_s19 }
  0xa2   : >> { %v219_v15 = vsel %vm218_vm0, %v663_v12, %v216_v14  ;;  %v221_v16 = vsel %vm218_vm0, %v754_v6, %v220_v13  ;;  %s806_s17 = scalar_lea.hbm (%p208_p11), %s885_s2, %s459_s9  ;;  %s315_s20 = scalar_lea.sflag (%p208_p11), [#allocation3], %s751_s29 }
  0xa3   : >> { %v223_v17 = vrot.slane %v219_v15, 7  ;;  %v227_v18 = vrot.slane %v221_v16, 7  ;;  %s541_s24 = scalar_lea.vmem (%p208_p11), %s332_s19, 16  ;;  %s670_s25 = smov (%p208_p11), [#allocation2]  }
  0xa4   : > { %p542_p12 = scmp.ne.s32.totalorder (%p208_p11), %s332_s19, %s541_s24  ;;  %s545_s26 = sshll.u32 (%p208_p11), %s670_s25, 4  ;;  %s546_s26 = int_to_ptr.vmem [resolvable:$false] %s545_s26 }
  0xa5   : >> { %vm225_vm1 = vcmp.gt.f32.partialorder %v663_v12, %v223_v17  ;;  %s547_s27 = scalar_lea.vmem (%p208_p11), %s546_s26, 32  ;;  %p548_p1 = scmp.lt.s32.totalorder (%p208_p11), %s332_s19, %s546_s26 }
  0xa6   : >> { %v226_v19 = vsel %vm225_vm1, %v663_v12, %v223_v17  ;;  %v228_v20 = vsel %vm225_vm1, %v754_v6, %v227_v18  ;;  %p543_p13 = pnand (%p208_p11), %p542_p12, %p730_p5  ;;  %p549_p2 = scmp.lt.s32.totalorder (%p208_p11), %s547_s27, %s541_s24 }
  0xa7   : >> { %v230_v21 = vrot.slane %v226_v19, 7  ;;  %v234_v22 = vrot.slane %v228_v20, 7 }
  0xa8   : > { %p544_p0 = pneg (%p208_p11), %p543_p13  ;;  %p550_p3 = por (%p208_p11), %p549_p2, %p548_p1 }
  0xa9   : >> { %vm232_vm3 = vcmp.gt.f32.partialorder %v663_v12, %v230_v21 }
  0xaa   : >> { %v233_v23 = vsel %vm232_vm3, %v663_v12, %v230_v21  ;;  %v235_v24 = vsel %vm232_vm3, %v754_v6, %v234_v22  ;;  %p551_p4 = pnand (%p208_p11), %p550_p3, %p544_p0 }
  0xab   : >> { %v237_v25 = vsel %vm236_vm2, %v233_v23, -inf }
  0xac   : >> { %238 = vmax.xlane.f32.xlu0 %v237_v25 }
 0x139   : >> { %v239_v28 = vpop.xlane.xlu0 %238 }
 0x13a   : >> { %vm240_vm5 = vcmp.eq.f32.partialorder %v233_v23, %v239_v28  ;;  %v259_v29 = vsel %vm773_vm4, %v239_v28, %v659_v11  }
 0x13b   : >> { %v241_v30 = vsel %vm240_vm5, %v235_v24, 512  ;;  %v658_v11 = vmov %v259_v29  }
 0x13c   : >> { %v242_v31 = vsel %vm236_vm2, %v241_v30, 2147483647 }
 0x13d   : >> { %v244_v32 = vshra.s32 %v242_v31, 16  ;;  %v243_v34 = vand.u32 65535, %v242_v31 }
 0x13f   : >> { %v246_v33 = vcvt.s32.f32 %v244_v32  ;;  %v245_v36 = vcvt.s32.f32 %v243_v34 }
 0x141   : >> { %247 = vmin.xlane.f32.xlu0 %v246_v33 }
 0x1ce   : >> { %v248_v35 = vpop.xlane.xlu0 %247 }
 0x1cf   : >> { %vm249_vm6 = vcmp.eq.f32.partialorder %v246_v33, %v248_v35  ;;  %v254_v38 = vcvt.f32.s32 %v248_v35 }
 0x1d0   : >> { %v250_v37 = vsel %vm249_vm6, %v245_v36, inf }
 0x1d1   : >> { %251 = vmin.xlane.f32.xlu1 %v250_v37  ;;  %v255_v40 = vshll.u32 %v254_v38, 16 }
 0x25e   : >> { %v252_v39 = vpop.xlane.xlu1 %251 }
 0x25f   : >> { %v253_v42 = vcvt.f32.s32 %v252_v39 }
 0x261   : >> { %v256_v43 = vadd.s32 %v255_v40, %v253_v42  ;;  %210 = sbr.rel (!%p208_p11) target bundleno = 159 (0x9f), region = 90 }
 0x263   : >> { %v783_v10 = vsel %vm773_vm4, %v256_v43, %v655_v10   ;;  %v264_v45 = vrot.slane %v256_v43, %v263_v41 }
 0x264   : >> { %v891_v44 = vmov %v783_v10 }
 0x265   : >> { %vm265_vm7 = vcmp.eq.s32.totalorder %v754_v6, %v264_v45  ;;  %v654_v10 = vmov %v891_v44  }
 0x266   : >> { %v266_v46 = vsel %vm265_vm7, -inf, %v663_v12  }
 0x267   : >> { %v662_v12 = vmov %v266_v46   ;;  %v268_v47 = vrot.slane (%p208_p11), %v266_v46, 7 }
 0x269   : > { %vm270_vm8 = vcmp.gt.f32.partialorder %v266_v46, %v268_v47 }
 0x26a   : > { %v271_v48 = vsel %vm270_vm8, %v266_v46, %v268_v47  ;;  %v273_v49 = vsel %vm270_vm8, %v754_v6, %v220_v13 }
 0x26b   : > { %v275_v50 = vrot.slane %v271_v48, 7  ;;  %v279_v51 = vrot.slane %v273_v49, 7 }
 0x26d   : > { %vm277_vm9 = vcmp.gt.f32.partialorder %v266_v46, %v275_v50 }
 0x26e   : > { %v278_v52 = vsel %vm277_vm9, %v266_v46, %v275_v50  ;;  %v280_v53 = vsel %vm277_vm9, %v754_v6, %v279_v51 }
 0x26f   : > { %v282_v54 = vrot.slane %v278_v52, 7  ;;  %v286_v55 = vrot.slane %v280_v53, 7 }
 0x271   : > { %vm284_vm10 = vcmp.gt.f32.partialorder %v266_v46, %v282_v54 }
 0x272   : > { %v285_v56 = vsel %vm284_vm10, %v266_v46, %v282_v54  ;;  %v287_v57 = vsel %vm284_vm10, %v754_v6, %v286_v55 }
 0x273   : > { %v289_v58 = vsel %vm236_vm2, %v285_v56, -inf }
 0x274   : > { %290 = vmax.xlane.f32.xlu0 %v289_v58 }
 0x301   : > { %v291_v59 = vpop.xlane.xlu0 %290 }
 0x302   : > { %vm292_vm12 = vcmp.eq.f32.partialorder %v285_v56, %v291_v59  ;;  %v310_v60 = vsel %vm309_vm11, %v291_v59, %v259_v29 }
 0x303   : > { %v293_v61 = vsel %vm292_vm12, %v287_v57, 512  ;;  %311 = vst [vmem:[%s177_s6 - $0x3] sm:$0x8] %v310_v60 }
 0x304   : > { %v294_v62 = vsel %vm236_vm2, %v293_v61, 2147483647 }
 0x305   : > { %v296_v63 = vshra.s32 %v294_v62, 16  ;;  %v295_v1 = vand.u32 65535, %v294_v62 }
 0x307   : > { %v298_v0 = vcvt.s32.f32 %v296_v63  ;;  %v297_v3 = vcvt.s32.f32 %v295_v1 }
 0x309   : > { %299 = vmin.xlane.f32.xlu0 %v298_v0 }
 0x396   : > { %v300_v2 = vpop.xlane.xlu0 %299 }
 0x397   : > { %vm301_vm13 = vcmp.eq.f32.partialorder %v298_v0, %v300_v2 }
 0x398   : > { %v302_v5 = vsel %vm301_vm13, %v297_v3, inf }
 0x399   : > { %303 = vmin.xlane.f32.xlu1 %v302_v5 }
 0x39a   : > { %554 = shalt.err (!%p551_p4)
}
 0x39b   : > { %s555_s28 = scalar_lea.hbm %s806_s17, 16  ;;  %s559_s5 = scalar_lea.hbm %s885_s2, 32 }
 0x39c   : > { %p556_p7 = scmp.ne.s32.totalorder %s806_s17, %s555_s28  ;;  %p560_p10 = scmp.lt.u32.totalorder %s806_s17, %s885_s2 }
 0x39d   : > { %p561_p11 = scmp.lt.u32.totalorder %s559_s5, %s555_s28  ;;  %p563_p13 = scmp.lt.u32.totalorder %s555_s28, %s806_s17 }
 0x39e   : > { %p557_p8 = pnand %p556_p7, %p730_p5 }
 0x39f   : > { %p562_p12 = por %p561_p11, %p560_p10 }
 0x3a0   : > { %p558_p9 = pneg %p557_p8 }
 0x3a1   : > { %p564_p0 = por %p563_p13, %p562_p12 }
 0x3a3   : > { %p565_p1 = pnand %p564_p0, %p558_p9 }
 0x3a5   : > { %568 = shalt.err (!%p565_p1)
}
 0x3a6   : > { %463 = dma.vmem_to_hbm [thread:$0]  (%p730_p5), %s332_s19, 16, %s806_s17, %s315_s20   ;;  %v306_v6 = vcvt.f32.s32 %v300_v2 }
 0x3a7   : > { %s344_s10 = sshll.u32 %s183_s7, 4  ;;  %s835_s25 = scalar_lea.hbm %s886_s3, %s459_s9  ;;  %s837_s10 = int_to_ptr.vmem [resolvable:$true] %s344_s10 }
 0x3a8   : > { %v307_v8 = vshll.u32 %v306_v6, 16  ;;  %s319_s17 = scalar_lea.sflag [#allocation5], %s751_s29  ;;  %s569_s19 = scalar_lea.vmem %s837_s10, 16 }
 0x3a9   : > { %p570_p2 = scmp.ne.s32.totalorder %s837_s10, %s569_s19  ;;  %s671_s16 = smov [#allocation4]  }
 0x3aa   : > { %s573_s9 = sshll.u32 %s671_s16, 4  ;;  %s574_s9 = int_to_ptr.vmem [resolvable:$false] %s573_s9 }
 0x3ab   : > { %p571_p3 = pnand %p570_p2, %p730_p5  ;;  %s575_s20 = scalar_lea.vmem %s574_s9, 32 }
 0x3ac   : > { %p576_p7 = scmp.lt.s32.totalorder %s837_s10, %s574_s9  ;;  %p577_p8 = scmp.lt.s32.totalorder %s575_s20, %s569_s19 }
 0x3ad   : > { %p572_p4 = pneg %p571_p3 }
 0x3ae   : > { %p578_p9 = por %p577_p8, %p576_p7 }
 0x3b0   : > { %p579_p10 = pnand %p578_p9, %p572_p4 }
 0x426   : > { %v304_v7 = vpop.xlane.xlu1 %303 }
 0x427   : > { %v305_v9 = vcvt.f32.s32 %v304_v7 }
 0x429   : > { %v308_v10 = vadd.s32 %v307_v8, %v305_v9 }
 0x42b   : > { %v312_v11 = vsel %vm309_vm11, %v308_v10, %v891_v44 }
 0x42c   : > { %313 = vst [vmem:[%s183_s7 - $0x3] sm:$0x8] %v312_v11 }
 0x42d   : > { %582 = shalt.err (!%p579_p10)
}
 0x42e   : > { %s583_s29 = scalar_lea.hbm %s835_s25, 16  ;;  %s587_s27 = scalar_lea.hbm %s886_s3, 32 }
 0x42f   : > { %p584_p11 = scmp.ne.s32.totalorder %s835_s25, %s583_s29  ;;  %p588_p0 = scmp.lt.u32.totalorder %s835_s25, %s886_s3 }
 0x430   : > { %p589_p1 = scmp.lt.u32.totalorder %s587_s27, %s583_s29  ;;  %p591_p3 = scmp.lt.u32.totalorder %s583_s29, %s835_s25 }
 0x431   : > { %p585_p12 = pnand %p584_p11, %p730_p5 }
 0x432   : > { %p590_p2 = por %p589_p1, %p588_p0 }
 0x433   : > { %p586_p13 = pneg %p585_p12 }
 0x434   : > { %p592_p4 = por %p591_p3, %p590_p2 }
 0x436   : > { %p593_p7 = pnand %p592_p4, %p586_p13 }
 0x438   : > { %596 = shalt.err (!%p593_p7)
}
 0x439   : > { %464 = dma.vmem_to_hbm [thread:$0]  (%p730_p5), %s837_s10, 16, %s835_s25, %s319_s17  }
 0x43a PF: > { %p474_p8 = scmp.ge.s32.totalorder %s651_s15, 2  ;;  %s356_s4 = sand.u32 1, %s639_s12  }
 0x43b   : > { %s357_s5 = scalar_lea.sflag [#allocation3], %s356_s4 }
 0x43c   : > { %p468_p9 = pnand %p474_p8, %p734_p6 }
 0x43e   : > { %630 = dma.done.wait (!%p468_p9), %s357_s5, 16  }
 0x43f   : > { %632 = vsyncadd (!%p468_p9), %s357_s5, 4294967280  ;;  %s365_s6 = scalar_lea.sflag [#allocation5], %s356_s4 }
 0x440   : > { %634 = dma.done.wait (!%p468_p9), %s365_s6, 16  }
 0x441   : > { %636 = vsyncadd (!%p468_p9), %s365_s6, 4294967280  ;;  %p17_p5 = scmp.ge.s32.totalorder %s717_s18, 4   ;;  %s892_s12 = smov %s643_s13 }
 0x442   : > { %s893_s13 = smov %s647_s14  ;;  %s894_s14 = smov %s728_s21 }
 0x443   : > { %s895_s15 = smov %s717_s18  ;;  %19 = sbr.rel (!%p17_p5) target bundleno = 5 (0x5), region = 101 }
 0x44a   :  { %369 = vsyncpa [#allocation3], 1 }
 0x44b   :  { %371 = vsyncpa [#allocation3 + $0x1], 1 }
 0x44c   :  { %372 = vsyncpa [#allocation5], 1 }
 0x44d   :  { %374 = vsyncpa [#allocation5 + $0x1], 1 }

</bundles_post_ra>
